<compile_context>
chip_gen: v7x
topology: tpu7x:2x2x1
jax: 0.10.0
libtpu: 0.0.40
codegen_flags: <defaults>
</compile_context>

<pallas_src>
import jax
import jax.numpy as jnp
from jax.experimental import pallas as pl
from jax.experimental.pallas import tpu as pltpu


def _round_up(n, m):
    return (n + m - 1) // m * m


def vae_kernel(
    x_ref, eps_ref,
    w1_ref, b1_ref,
    w23_ref, b23_ref,
    w4_ref, b4_ref,
    w5_ref, b5_ref,
    xrec_ref, musig_ref,
):
    z_dim = eps_ref.shape[-1]

    # ---- encode: h = relu(x @ W1 + b1)  (bf16 MXU inputs, f32 accumulate) ----
    x = x_ref[...].astype(jnp.bfloat16)
    h = jnp.dot(x, w1_ref[...], preferred_element_type=jnp.float32) + b1_ref[...]
    h = jnp.maximum(h, 0.0)

    # ---- fused mu / log_var head: single (h_dim, 2*z_dim) matmul ----
    musig = jnp.dot(h.astype(jnp.bfloat16), w23_ref[...],
                    preferred_element_type=jnp.float32) + b23_ref[...]
    mu = musig[:, :z_dim]
    log_var = musig[:, z_dim:]

    # ---- reparameterize: z = mu + eps * exp(log_var / 2)  (f32) ----
    std = jnp.exp(log_var * 0.5)
    z = mu + eps_ref[...] * std

    # ---- decode: sigmoid(relu(z @ W4 + b4) @ W5 + b5) ----
    h2 = jnp.dot(z.astype(jnp.bfloat16), w4_ref[...],
                 preferred_element_type=jnp.float32) + b4_ref[...]
    h2 = jnp.maximum(h2, 0.0)
    logits = jnp.dot(h2.astype(jnp.bfloat16), w5_ref[...],
                     preferred_element_type=jnp.float32) + b5_ref[...]
    # sigmoid = 1 / (1 + exp(-x)); exp and reciprocal both land on the EUP slot.
    x_reconst = pl.reciprocal(1.0 + jnp.exp(-logits), approx=True)

    xrec_ref[...] = x_reconst.astype(xrec_ref.dtype)
    musig_ref[...] = musig.astype(musig_ref.dtype)


@jax.jit
def vae_forward(x, eps, kp):
    """Whole VAE forward in one batch-gridded Pallas call."""
    B, image_size = x.shape
    z_dim = eps.shape[1]

    # MXU-friendly batch tile (256 rows once B is large; single tile at tiny B).
    tm = min(256, _round_up(B, 8))
    b_pad = _round_up(B, tm)
    if b_pad != B:
        x = jnp.pad(x, ((0, b_pad - B), (0, 0)))
        eps = jnp.pad(eps, ((0, b_pad - B), (0, 0)))

    grid = (b_pad // tm,)

    def batched(nf):
        return pl.BlockSpec((tm, nf), lambda i: (i, 0))

    def resident(arr):
        return pl.BlockSpec(arr.shape, lambda i: (0, 0))

    in_specs = [
        batched(image_size),                         # x
        batched(z_dim),                              # eps
        resident(kp["w1"]), resident(kp["b1"]),
        resident(kp["w23"]), resident(kp["b23"]),
        resident(kp["w4"]), resident(kp["b4"]),
        resident(kp["w5"]), resident(kp["b5"]),
    ]
    out_specs = (batched(image_size), batched(2 * z_dim))
    out_shape = (
        jax.ShapeDtypeStruct((b_pad, image_size), jnp.float32),   # x_reconst
        jax.ShapeDtypeStruct((b_pad, 2 * z_dim), jnp.float32),    # [mu | log_var]
    )

    xrec, musig = pl.pallas_call(
        vae_kernel,
        grid=grid,
        in_specs=in_specs,
        out_specs=out_specs,
        out_shape=out_shape,
        compiler_params=pltpu.CompilerParams(
            dimension_semantics=("parallel",),
            vmem_limit_bytes=16 << 20,
        ),
    )(
        x, eps,
        kp["w1"], kp["b1"],
        kp["w23"], kp["b23"],
        kp["w4"], kp["b4"],
        kp["w5"], kp["b5"],
    )

    xrec = xrec[:B]
    mu = musig[:B, :z_dim]
    log_var = musig[:B, z_dim:]
    return xrec, mu, log_var


def init_params(key, image_size, h_dim, z_dim):
    """f32 params mirroring nn.Linear default init (U(-1/sqrt(fan_in), +))."""
    def linear(k, fan_in, fan_out):
        kw, kb = jax.random.split(k)
        bound = 1.0 / jnp.sqrt(fan_in)
        w = jax.random.uniform(kw, (fan_in, fan_out), jnp.float32, -bound, bound)
        b = jax.random.uniform(kb, (1, fan_out), jnp.float32, -bound, bound)
        return w, b

    k1, k2, k3, k4, k5 = jax.random.split(key, 5)
    w1, b1 = linear(k1, image_size, h_dim)   # fc1
    w2, b2 = linear(k2, h_dim, z_dim)        # fc2 (mu)
    w3, b3 = linear(k3, h_dim, z_dim)        # fc3 (log_var)
    w4, b4 = linear(k4, z_dim, h_dim)        # fc4
    w5, b5 = linear(k5, h_dim, image_size)   # fc5
    return dict(w1=w1, b1=b1, w2=w2, b2=b2, w3=w3, b3=b3,
                w4=w4, b4=b4, w5=w5, b5=b5)


def pack_kernel_params(p):
    """Fuse the mu/log_var heads and cast matmul weights to bf16 (biases stay f32)."""
    return dict(
        w1=p["w1"].astype(jnp.bfloat16), b1=p["b1"],
        w23=jnp.concatenate([p["w2"], p["w3"]], axis=1).astype(jnp.bfloat16),
        b23=jnp.concatenate([p["b2"], p["b3"]], axis=1),
        w4=p["w4"].astype(jnp.bfloat16), b4=p["b4"],
        w5=p["w5"].astype(jnp.bfloat16), b5=p["b5"],
    )


def vae_forward_ref(x, eps, p):
    """Pure-JAX f32 reference matching the PyTorch module exactly."""
    h = jax.nn.relu(x @ p["w1"] + p["b1"])
    mu = h @ p["w2"] + p["b2"]
    log_var = h @ p["w3"] + p["b3"]
    std = jnp.exp(log_var / 2)
    z = mu + eps * std
    h2 = jax.nn.relu(z @ p["w4"] + p["b4"])
    x_reconst = jax.nn.sigmoid(h2 @ p["w5"] + p["b5"])
    return x_reconst, mu, log_var


if __name__ == "__main__":
    # Small shapes consistent with the module's forward (flattened images -> MLP VAE).
    B, IMAGE_SIZE, H_DIM, Z_DIM = 8, 256, 128, 32

    root = jax.random.PRNGKey(0)
    k_x, k_eps, k_params = jax.random.split(root, 3)

    x = jax.random.uniform(k_x, (B, IMAGE_SIZE), jnp.float32)   # normalized pixels
    eps = jax.random.normal(k_eps, (B, Z_DIM), jnp.float32)     # torch.randn_like(std)
    params = init_params(k_params, IMAGE_SIZE, H_DIM, Z_DIM)
    kparams = pack_kernel_params(params)

    x_reconst, mu, log_var = vae_forward(x, eps, kparams)
    jax.block_until_ready((x_reconst, mu, log_var))

    # Sanity check against pure-JAX f32 reference (bf16 matmul inputs => looser tol).
    xr_ref, mu_ref, lv_ref = vae_forward_ref(x, eps, params)
    assert x_reconst.shape == (B, IMAGE_SIZE)
    assert mu.shape == (B, Z_DIM) and log_var.shape == (B, Z_DIM)
    assert jnp.allclose(x_reconst, xr_ref, atol=2e-2, rtol=2e-2)
    assert jnp.allclose(mu, mu_ref, atol=2e-2, rtol=2e-2)
    assert jnp.allclose(log_var, lv_ref, atol=2e-2, rtol=2e-2)

    print("KERNEL_OK")
</pallas_src>

<mosaic_0001>
module attributes {stable_mosaic.version = 11 : i64} {
  func.func @vae_kernel(%arg0: i32, %arg1: memref<8x256xf32, #tpu.memory_space<vmem>>, %arg2: memref<8x32xf32, #tpu.memory_space<vmem>>, %arg3: memref<256x128xbf16, #tpu.memory_space<vmem>>, %arg4: memref<1x128xf32, #tpu.memory_space<vmem>>, %arg5: memref<128x64xbf16, #tpu.memory_space<vmem>>, %arg6: memref<1x64xf32, #tpu.memory_space<vmem>>, %arg7: memref<32x128xbf16, #tpu.memory_space<vmem>>, %arg8: memref<1x128xf32, #tpu.memory_space<vmem>>, %arg9: memref<128x256xbf16, #tpu.memory_space<vmem>>, %arg10: memref<1x256xf32, #tpu.memory_space<vmem>>, %arg11: memref<8x256xf32, #tpu.memory_space<vmem>>, %arg12: memref<8x64xf32, #tpu.memory_space<vmem>>) attributes {dimension_semantics = [#tpu.dimension_semantics<parallel>], iteration_bounds = array<i64: 1>, scalar_prefetch = 0 : i64, scratch_operands = 0 : i64, tpu.core_type = #tpu.core_type<tc>, window_params = [{transform_indices = @transform_0, window_bounds = array<i64: 8, 256>}, {transform_indices = @transform_1, window_bounds = array<i64: 8, 32>}, {pipeline_mode = #tpu.pipeline_mode<synchronous>, transform_indices = @transform_2, window_bounds = array<i64: 256, 128>}, {pipeline_mode = #tpu.pipeline_mode<synchronous>, transform_indices = @transform_3, window_bounds = array<i64: 1, 128>}, {pipeline_mode = #tpu.pipeline_mode<synchronous>, transform_indices = @transform_4, window_bounds = array<i64: 128, 64>}, {pipeline_mode = #tpu.pipeline_mode<synchronous>, transform_indices = @transform_5, window_bounds = array<i64: 1, 64>}, {pipeline_mode = #tpu.pipeline_mode<synchronous>, transform_indices = @transform_6, window_bounds = array<i64: 32, 128>}, {pipeline_mode = #tpu.pipeline_mode<synchronous>, transform_indices = @transform_7, window_bounds = array<i64: 1, 128>}, {pipeline_mode = #tpu.pipeline_mode<synchronous>, transform_indices = @transform_8, window_bounds = array<i64: 128, 256>}, {pipeline_mode = #tpu.pipeline_mode<synchronous>, transform_indices = @transform_9, window_bounds = array<i64: 1, 256>}, {transform_indices = @transform_10, window_bounds = array<i64: 8, 256>}, {transform_indices = @transform_11, window_bounds = array<i64: 8, 64>}]} {
    %c0 = arith.constant 0 : index
    %c0_0 = arith.constant 0 : index
    %0 = vector.load %arg1[%c0, %c0_0] : memref<8x256xf32, #tpu.memory_space<vmem>>, vector<8x256xf32>
    %1 = arith.truncf %0 : vector<8x256xf32> to vector<8x256xbf16>
    %c0_1 = arith.constant 0 : index
    %c0_2 = arith.constant 0 : index
    %2 = vector.load %arg3[%c0_1, %c0_2] : memref<256x128xbf16, #tpu.memory_space<vmem>>, vector<256x128xbf16>
    %cst = arith.constant dense<0.000000e+00> : vector<8x128xf32>
    %3 = tpu.matmul %1, %2, %cst {dimension_numbers = #tpu.dot_dimension_numbers<[1], [0], [0], [1], [0, 0, 1, 1], [], []>} : vector<8x256xbf16>, vector<256x128xbf16>, vector<8x128xf32> -> vector<8x128xf32>
    %c0_3 = arith.constant 0 : index
    %c0_4 = arith.constant 0 : index
    %4 = vector.load %arg4[%c0_3, %c0_4] : memref<1x128xf32, #tpu.memory_space<vmem>>, vector<1x128xf32>
    %5 = vector.broadcast %4 : vector<1x128xf32> to vector<8x128xf32>
    %6 = arith.addf %3, %5 : vector<8x128xf32>
    %cst_5 = arith.constant 0.000000e+00 : f32
    %7 = vector.broadcast %cst_5 : f32 to vector<8x128xf32>
    %8 = arith.maximumf %6, %7 : vector<8x128xf32>
    %9 = arith.truncf %8 : vector<8x128xf32> to vector<8x128xbf16>
    %c0_6 = arith.constant 0 : index
    %c0_7 = arith.constant 0 : index
    %10 = vector.load %arg5[%c0_6, %c0_7] : memref<128x64xbf16, #tpu.memory_space<vmem>>, vector<128x64xbf16>
    %cst_8 = arith.constant dense<0.000000e+00> : vector<8x64xf32>
    %11 = tpu.matmul %9, %10, %cst_8 {dimension_numbers = #tpu.dot_dimension_numbers<[1], [0], [0], [1], [0, 0, 1, 1], [], []>} : vector<8x128xbf16>, vector<128x64xbf16>, vector<8x64xf32> -> vector<8x64xf32>
    %c0_9 = arith.constant 0 : index
    %c0_10 = arith.constant 0 : index
    %12 = vector.load %arg6[%c0_9, %c0_10] : memref<1x64xf32, #tpu.memory_space<vmem>>, vector<1x64xf32>
    %13 = vector.broadcast %12 : vector<1x64xf32> to vector<8x64xf32>
    %14 = arith.addf %11, %13 : vector<8x64xf32>
    %15 = vector.extract_strided_slice %14 {offsets = [0, 0], sizes = [8, 32], strides = [1, 1]} : vector<8x64xf32> to vector<8x32xf32>
    %16 = vector.extract_strided_slice %14 {offsets = [0, 32], sizes = [8, 32], strides = [1, 1]} : vector<8x64xf32> to vector<8x32xf32>
    %cst_11 = arith.constant 5.000000e-01 : f32
    %17 = vector.broadcast %cst_11 : f32 to vector<8x32xf32>
    %18 = arith.mulf %16, %17 : vector<8x32xf32>
    %19 = math.exp %18 : vector<8x32xf32>
    %c0_12 = arith.constant 0 : index
    %c0_13 = arith.constant 0 : index
    %20 = vector.load %arg2[%c0_12, %c0_13] : memref<8x32xf32, #tpu.memory_space<vmem>>, vector<8x32xf32>
    %21 = arith.mulf %20, %19 : vector<8x32xf32>
    %22 = arith.addf %15, %21 : vector<8x32xf32>
    %23 = arith.truncf %22 : vector<8x32xf32> to vector<8x32xbf16>
    %c0_14 = arith.constant 0 : index
    %c0_15 = arith.constant 0 : index
    %24 = vector.load %arg7[%c0_14, %c0_15] : memref<32x128xbf16, #tpu.memory_space<vmem>>, vector<32x128xbf16>
    %cst_16 = arith.constant dense<0.000000e+00> : vector<8x128xf32>
    %25 = tpu.matmul %23, %24, %cst_16 {dimension_numbers = #tpu.dot_dimension_numbers<[1], [0], [0], [1], [0, 0, 1, 1], [], []>} : vector<8x32xbf16>, vector<32x128xbf16>, vector<8x128xf32> -> vector<8x128xf32>
    %c0_17 = arith.constant 0 : index
    %c0_18 = arith.constant 0 : index
    %26 = vector.load %arg8[%c0_17, %c0_18] : memref<1x128xf32, #tpu.memory_space<vmem>>, vector<1x128xf32>
    %27 = vector.broadcast %26 : vector<1x128xf32> to vector<8x128xf32>
    %28 = arith.addf %25, %27 : vector<8x128xf32>
    %cst_19 = arith.constant 0.000000e+00 : f32
    %29 = vector.broadcast %cst_19 : f32 to vector<8x128xf32>
    %30 = arith.maximumf %28, %29 : vector<8x128xf32>
    %31 = arith.truncf %30 : vector<8x128xf32> to vector<8x128xbf16>
    %c0_20 = arith.constant 0 : index
    %c0_21 = arith.constant 0 : index
    %32 = vector.load %arg9[%c0_20, %c0_21] : memref<128x256xbf16, #tpu.memory_space<vmem>>, vector<128x256xbf16>
    %cst_22 = arith.constant dense<0.000000e+00> : vector<8x256xf32>
    %33 = tpu.matmul %31, %32, %cst_22 {dimension_numbers = #tpu.dot_dimension_numbers<[1], [0], [0], [1], [0, 0, 1, 1], [], []>} : vector<8x128xbf16>, vector<128x256xbf16>, vector<8x256xf32> -> vector<8x256xf32>
    %c0_23 = arith.constant 0 : index
    %c0_24 = arith.constant 0 : index
    %34 = vector.load %arg10[%c0_23, %c0_24] : memref<1x256xf32, #tpu.memory_space<vmem>>, vector<1x256xf32>
    %35 = vector.broadcast %34 : vector<1x256xf32> to vector<8x256xf32>
    %36 = arith.addf %33, %35 : vector<8x256xf32>
    %cst_25 = arith.constant 0.000000e+00 : f32
    %37 = vector.broadcast %cst_25 : f32 to vector<8x256xf32>
    %38 = arith.subf %37, %36 : vector<8x256xf32>
    %39 = math.exp %38 : vector<8x256xf32>
    %cst_26 = arith.constant 1.000000e+00 : f32
    %40 = vector.broadcast %cst_26 : f32 to vector<8x256xf32>
    %41 = arith.addf %40, %39 : vector<8x256xf32>
    %42 = tpu.reciprocal %41 {approx = true} : vector<8x256xf32> -> vector<8x256xf32>
    %c0_27 = arith.constant 0 : index
    %c0_28 = arith.constant 0 : index
    %43 = vector.load %arg11[%c0_27, %c0_28] : memref<8x256xf32, #tpu.memory_space<vmem>>, vector<8x256xf32>
    tpu.vector_store %arg11[%c0_27, %c0_28], %42 {strides = array<i32>} : memref<8x256xf32, #tpu.memory_space<vmem>>, vector<8x256xf32>,
    %c0_29 = arith.constant 0 : index
    %c0_30 = arith.constant 0 : index
    %44 = vector.load %arg12[%c0_29, %c0_30] : memref<8x64xf32, #tpu.memory_space<vmem>>, vector<8x64xf32>
    tpu.vector_store %arg12[%c0_29, %c0_30], %14 {strides = array<i32>} : memref<8x64xf32, #tpu.memory_space<vmem>>, vector<8x64xf32>,
    return
  }
  func.func @transform_0(%arg0: i32) -> (i32, i32) {
    %c0_i32 = arith.constant 0 : i32
    %c0_i32_0 = arith.constant 0 : i32
    return %arg0, %c0_i32 : i32, i32
  }
  func.func @transform_1(%arg0: i32) -> (i32, i32) {
    %c0_i32 = arith.constant 0 : i32
    %c0_i32_0 = arith.constant 0 : i32
    return %arg0, %c0_i32 : i32, i32
  }
  func.func @transform_2(%arg0: i32) -> (i32, i32) {
    %c0_i32 = arith.constant 0 : i32
    %c0_i32_0 = arith.constant 0 : i32
    %c0_i32_1 = arith.constant 0 : i32
    return %c0_i32, %c0_i32_0 : i32, i32
  }
  func.func @transform_3(%arg0: i32) -> (i32, i32) {
    %c0_i32 = arith.constant 0 : i32
    %c0_i32_0 = arith.constant 0 : i32
    %c0_i32_1 = arith.constant 0 : i32
    return %c0_i32, %c0_i32_0 : i32, i32
  }
  func.func @transform_4(%arg0: i32) -> (i32, i32) {
    %c0_i32 = arith.constant 0 : i32
    %c0_i32_0 = arith.constant 0 : i32
    %c0_i32_1 = arith.constant 0 : i32
    return %c0_i32, %c0_i32_0 : i32, i32
  }
  func.func @transform_5(%arg0: i32) -> (i32, i32) {
    %c0_i32 = arith.constant 0 : i32
    %c0_i32_0 = arith.constant 0 : i32
    %c0_i32_1 = arith.constant 0 : i32
    return %c0_i32, %c0_i32_0 : i32, i32
  }
  func.func @transform_6(%arg0: i32) -> (i32, i32) {
    %c0_i32 = arith.constant 0 : i32
    %c0_i32_0 = arith.constant 0 : i32
    %c0_i32_1 = arith.constant 0 : i32
    return %c0_i32, %c0_i32_0 : i32, i32
  }
  func.func @transform_7(%arg0: i32) -> (i32, i32) {
    %c0_i32 = arith.constant 0 : i32
    %c0_i32_0 = arith.constant 0 : i32
    %c0_i32_1 = arith.constant 0 : i32
    return %c0_i32, %c0_i32_0 : i32, i32
  }
  func.func @transform_8(%arg0: i32) -> (i32, i32) {
    %c0_i32 = arith.constant 0 : i32
    %c0_i32_0 = arith.constant 0 : i32
    %c0_i32_1 = arith.constant 0 : i32
    return %c0_i32, %c0_i32_0 : i32, i32
  }
  func.func @transform_9(%arg0: i32) -> (i32, i32) {
    %c0_i32 = arith.constant 0 : i32
    %c0_i32_0 = arith.constant 0 : i32
    %c0_i32_1 = arith.constant 0 : i32
    return %c0_i32, %c0_i32_0 : i32, i32
  }
  func.func @transform_10(%arg0: i32) -> (i32, i32) {
    %c0_i32 = arith.constant 0 : i32
    %c0_i32_0 = arith.constant 0 : i32
    return %arg0, %c0_i32 : i32, i32
  }
  func.func @transform_11(%arg0: i32) -> (i32, i32) {
    %c0_i32 = arith.constant 0 : i32
    %c0_i32_0 = arith.constant 0 : i32
    return %arg0, %c0_i32 : i32, i32
  }
}

</mosaic_0001>

<bundles_post_ra>
// kernel: vae_forward.1
= control target key start
LH: loop header
LB: loop body
LE: loop exit
PB: predicated region body
PF: predicated region fallthrough
CT: control target
= control target key end

     0   :  { %17 = vsyncpa [#allocation3], 0  ;;  %s1315_s0 = inlined_call_operand.hbm [shape: f32[8,256], index: 0, kind: input, shape index: {}]   ;;  %s1316_s1 = inlined_call_operand.hbm [shape: f32[8,32], index: 1, kind: input, shape index: {}]   ;;  %s1317_s2 = inlined_call_operand.hbm [shape: bf16[256,128], index: 2, kind: input, shape index: {}]   ;;  %s1318_s3 = inlined_call_operand.hbm [shape: f32[1,128], index: 3, kind: input, shape index: {}]   ;;  %s1319_s4 = inlined_call_operand.vmem [shape: bf16[128,64], index: 4, kind: input, shape index: {}]   ;;  %s1320_s5 = inlined_call_operand.hbm [shape: f32[1,64], index: 5, kind: input, shape index: {}]   ;;  %s1321_s6 = inlined_call_operand.hbm [shape: bf16[32,128], index: 6, kind: input, shape index: {}]   ;;  %s1322_s7 = inlined_call_operand.hbm [shape: f32[1,128], index: 7, kind: input, shape index: {}]   ;;  %s1323_s8 = inlined_call_operand.vmem [shape: bf16[128,256], index: 8, kind: input, shape index: {}]   ;;  %s1324_s9 = inlined_call_operand.vmem [shape: f32[1,256], index: 9, kind: input, shape index: {}]   ;;  %s1325_s10 = inlined_call_operand.hbm [shape: f32[8,256], index: 10, kind: output, shape index: {0}]   ;;  %s1326_s11 = inlined_call_operand.vmem [shape: f32[8,64], index: 11, kind: output, shape index: {1}]  }
   0x1   :  { %18 = vsyncpa [#allocation6], 0 }
   0x2   :  { %19 = vsyncpa [#allocation9], 0 }
   0x3   :  { %20 = vsyncpa [#allocation12], 0 }
   0x4   :  { %21 = vsyncpa [#allocation4], 0  ;;  %s1049_s17 = smov [#allocation5]   ;;  %s1050_s19 = smov [#allocation8]  }
   0x5   :  { %s38_s18 = sshll.u32 %s1049_s17, 4  ;;  %s60_s20 = sshll.u32 %s1050_s19, 4  ;;  %s39_s18 = int_to_ptr.vmem [resolvable:$true] %s38_s18  ;;  %s61_s20 = int_to_ptr.vmem [resolvable:$true] %s60_s20 }
   0x6   :  { %s863_s23 = scalar_lea.hbm %s1316_s1, 128 }
   0x7   :  { %p864_p0 = scmp.ne.s32.totalorder %s1316_s1, %s863_s23  ;;  %p867_p1 = scmp.lt.u32.totalorder %s863_s23, %s1316_s1 }
   0x9   :  { %p869_p2 = pnand %p867_p1, %p864_p0 }
   0xb   :  { %872 = shalt.err (!%p869_p2)
}
   0xc   :  { %s873_s28 = scalar_lea.vmem %s39_s18, 128  ;;  %p878_p4 = scmp.lt.s32.totalorder %s39_s18, %s39_s18 }
   0xd   :  { %p874_p3 = scmp.ne.s32.totalorder %s39_s18, %s873_s28  ;;  %p879_p5 = scmp.lt.s32.totalorder %s873_s28, %s873_s28 }
   0xf   :  { %p880_p6 = por %p879_p5, %p878_p4 }
  0x11   :  { %p881_p7 = pnand %p880_p6, %p874_p3 }
  0x13   :  { %884 = shalt.err (!%p881_p7)
}
  0x14   :  { %41 = dma.hbm_to_vmem [thread:$0]  %s1316_s1, 128, %s39_s18, [#allocation6]  }
  0x15   :  { %s885_s14 = scalar_lea.hbm %s1318_s3, 16 }
  0x16   :  { %p886_p8 = scmp.ne.s32.totalorder %s1318_s3, %s885_s14  ;;  %p889_p9 = scmp.lt.u32.totalorder %s885_s14, %s1318_s3 }
  0x18   :  { %p891_p10 = pnand %p889_p9, %p886_p8 }
  0x1a   :  { %894 = shalt.err (!%p891_p10)
}
  0x1b   :  { %s895_s21 = scalar_lea.vmem %s61_s20, 16  ;;  %s899_s22 = scalar_lea.vmem %s61_s20, 32 }
  0x1c   :  { %p896_p11 = scmp.ne.s32.totalorder %s61_s20, %s895_s21  ;;  %p900_p12 = scmp.lt.s32.totalorder %s61_s20, %s61_s20 }
  0x1d   :  { %p901_p13 = scmp.lt.s32.totalorder %s899_s22, %s895_s21 }
  0x1f   :  { %p902_p0 = por %p901_p13, %p900_p12 }
  0x21   :  { %p903_p1 = pnand %p902_p0, %p896_p11 }
  0x23   :  { %906 = shalt.err (!%p903_p1)
}
  0x24   :  { %63 = dma.hbm_to_vmem [thread:$0]  %s1318_s3, 16, %s61_s20, [#allocation9]  }
  0x25   :  { %s1051_s23 = smov [#allocation11]   ;;  %s1052_s25 = smov [#allocation2]  }
  0x26   :  { %s81_s24 = sshll.u32 %s1051_s23, 4  ;;  %s28_s26 = sshll.u32 %s1052_s25, 4  ;;  %s82_s24 = int_to_ptr.vmem [resolvable:$true] %s81_s24  ;;  %s29_s26 = int_to_ptr.vmem [resolvable:$true] %s28_s26 }
  0x27   :  { %s907_s29 = scalar_lea.hbm %s1321_s6, 256 }
  0x28   :  { %p908_p2 = scmp.ne.s32.totalorder %s1321_s6, %s907_s29  ;;  %p911_p3 = scmp.lt.u32.totalorder %s907_s29, %s1321_s6 }
  0x2a   :  { %p913_p4 = pnand %p911_p3, %p908_p2 }
  0x2c   :  { %916 = shalt.err (!%p913_p4)
}
  0x2d   :  { %s917_s3 = scalar_lea.vmem %s82_s24, 256  ;;  %p922_p6 = scmp.lt.s32.totalorder %s82_s24, %s82_s24 }
  0x2e   :  { %p918_p5 = scmp.ne.s32.totalorder %s82_s24, %s917_s3  ;;  %p923_p7 = scmp.lt.s32.totalorder %s917_s3, %s917_s3 }
  0x30   :  { %p924_p8 = por %p923_p7, %p922_p6 }
  0x32   :  { %p925_p9 = pnand %p924_p8, %p918_p5 }
  0x34   :  { %928 = shalt.err (!%p925_p9)
}
  0x35   :  { %s1053_s20 = smov 64   ;;  %s1054_s15 = smov 4  }
  0x36   :  { %87 = dma.hbm_to_vmem [thread:$0]  %s1321_s6, 256, %s82_s24, [#allocation12], %s1053_s20, %s1053_s20, %s1054_s15  }
  0x37   :  { %s929_s22 = scalar_lea.hbm %s1315_s0, 256 }
  0x38   :  { %p930_p10 = scmp.ne.s32.totalorder %s1315_s0, %s929_s22  ;;  %p933_p11 = scmp.lt.u32.totalorder %s929_s22, %s1315_s0 }
  0x3a   :  { %p935_p12 = pnand %p933_p11, %p930_p10 }
  0x3c   :  { %938 = shalt.err (!%p935_p12)
}
  0x3d   :  { %s939_s27 = scalar_lea.vmem %s29_s26, 256  ;;  %p944_p0 = scmp.lt.s32.totalorder %s29_s26, %s29_s26 }
  0x3e   :  { %p940_p13 = scmp.ne.s32.totalorder %s29_s26, %s939_s27  ;;  %p945_p1 = scmp.lt.s32.totalorder %s939_s27, %s939_s27 }
  0x40   :  { %p946_p2 = por %p945_p1, %p944_p0 }
  0x42   :  { %p947_p3 = pnand %p946_p2, %p940_p13 }
  0x44   :  { %950 = shalt.err (!%p947_p3)
}
  0x45   :  { %31 = dma.hbm_to_vmem [thread:$0]  %s1315_s0, 256, %s29_s26, [#allocation3]  }
  0x46   :  { %s1055_s28 = smov [#allocation7]   ;;  %s1056_s30 = smov [#allocation10]  }
  0x47   :  { %s47_s29 = sshll.u32 %s1055_s28, 4  ;;  %s72_s12 = sshll.u32 %s1056_s30, 4  ;;  %s48_s29 = int_to_ptr.vmem [resolvable:$true] %s47_s29  ;;  %s73_s12 = int_to_ptr.vmem [resolvable:$true] %s72_s12 }
  0x48   :  { %s951_s3 = scalar_lea.hbm %s1317_s2, 2048 }
  0x49   :  { %p952_p4 = scmp.ne.s32.totalorder %s1317_s2, %s951_s3  ;;  %p955_p5 = scmp.lt.u32.totalorder %s951_s3, %s1317_s2 }
  0x4b   :  { %p957_p6 = pnand %p955_p5, %p952_p4 }
  0x4d   :  { %960 = shalt.err (!%p957_p6)
}
  0x4e   :  { %s961_s0 = scalar_lea.vmem %s48_s29, 2048  ;;  %p966_p8 = scmp.lt.s32.totalorder %s48_s29, %s48_s29 }
  0x4f   :  { %p962_p7 = scmp.ne.s32.totalorder %s48_s29, %s961_s0  ;;  %p967_p9 = scmp.lt.s32.totalorder %s961_s0, %s961_s0 }
  0x51   :  { %p968_p10 = por %p967_p9, %p966_p8 }
  0x53   :  { %p969_p11 = pnand %p968_p10, %p962_p7 }
  0x55   :  { %972 = shalt.err (!%p969_p11)
}
  0x56   :  { %53 = dma.hbm_to_vmem [thread:$0]  %s1317_s2, 2048, %s48_s29, [#allocation6], %s1053_s20, %s1053_s20, %s1054_s15  }
  0x57   :  { %s973_s23 = scalar_lea.hbm %s1320_s5, 16 }
  0x58   :  { %p974_p12 = scmp.ne.s32.totalorder %s1320_s5, %s973_s23  ;;  %p977_p13 = scmp.lt.u32.totalorder %s973_s23, %s1320_s5 }
  0x5a   :  { %p979_p0 = pnand %p977_p13, %p974_p12 }
  0x5c   :  { %982 = shalt.err (!%p979_p0)
}
  0x5d   :  { %s983_s28 = scalar_lea.vmem %s73_s12, 16  ;;  %s987_s30 = scalar_lea.vmem %s73_s12, 32 }
  0x5e   :  { %p984_p1 = scmp.ne.s32.totalorder %s73_s12, %s983_s28  ;;  %p988_p2 = scmp.lt.s32.totalorder %s73_s12, %s73_s12 }
  0x5f   :  { %p989_p3 = scmp.lt.s32.totalorder %s987_s30, %s983_s28 }
  0x61   :  { %p990_p4 = por %p989_p3, %p988_p2 }
  0x63   :  { %p991_p5 = pnand %p990_p4, %p984_p1 }
  0x65   :  { %994 = shalt.err (!%p991_p5)
}
  0x66   :  { %75 = dma.hbm_to_vmem [thread:$0]  %s1320_s5, 16, %s73_s12, [#allocation9]  }
  0x67   :  { %s1057_s15 = smov [#allocation13]   ;;  %s995_s3 = scalar_lea.hbm %s1322_s7, 16 }
  0x68   :  { %s94_s29 = sshll.u32 %s1057_s15, 4  ;;  %p996_p6 = scmp.ne.s32.totalorder %s1322_s7, %s995_s3  ;;  %s95_s29 = int_to_ptr.vmem [resolvable:$true] %s94_s29 }
  0x69   :  { %p999_p7 = scmp.lt.u32.totalorder %s995_s3, %s1322_s7 }
  0x6b   :  { %p1001_p8 = pnand %p999_p7, %p996_p6 }
  0x6d   :  { %1004 = shalt.err (!%p1001_p8)
}
  0x6e   :  { %s1005_s0 = scalar_lea.vmem %s95_s29, 16  ;;  %s1009_s5 = scalar_lea.vmem %s95_s29, 32 }
  0x6f   :  { %p1006_p9 = scmp.ne.s32.totalorder %s95_s29, %s1005_s0  ;;  %p1010_p10 = scmp.lt.s32.totalorder %s95_s29, %s95_s29 }
  0x70   :  { %p1011_p11 = scmp.lt.s32.totalorder %s1009_s5, %s1005_s0 }
  0x72   :  { %p1012_p12 = por %p1011_p11, %p1010_p10 }
  0x74   :  { %p1013_p13 = pnand %p1012_p12, %p1006_p9 }
  0x76   :  { %1016 = shalt.err (!%p1013_p13)
}
  0x77   :  { %97 = dma.hbm_to_vmem [thread:$0]  %s1322_s7, 16, %s95_s29, [#allocation12]  }
  0x78   :  { %1039 = dma.done.wait [#allocation3], 256  }
  0x79   :  { %1040 = vsyncadd [#allocation3], 4294967040 }
  0x7a   :  { %1041 = dma.done.wait [#allocation6], 2176  }
  0x7b   :  { %1042 = vsyncadd [#allocation6], 4294965120 }
  0x7c   :  { %1043 = dma.done.wait [#allocation9], 32  }
  0x7d   :  { %1044 = vsyncadd [#allocation9], 4294967264 }
  0x7e   :  { %1045 = dma.done.wait [#allocation12], 272  }
  0x7f   :  { %1046 = vsyncadd [#allocation12], 4294967024  ;;  %v1058_v0 = vmov 0.0   ;;  %v803_v1 = vld [vmem:[#allocation7 + $0x40] sm:$0xff]   ;;  %v805_v3 = vld [vmem:[#allocation7 + $0x48] sm:$0xff]   ;;  %vm1059_vm0 = vmmov 0  }
  0x80   :  { %761 = vmatprep.subr.bf16.mxu1 %v1058_v0  ;;  %v804_v2 = vld [vmem:[#allocation7] sm:$0xff]   ;;  %727 = vmatprep.subr.bf16.mxu0 %v803_v1  ;;  %v806_v4 = vld [vmem:[#allocation7 + $0x8] sm:$0xff]   ;;  %v807_v5 = vld [vmem:[#allocation7 + $0x50] sm:$0xff]   ;;  %vm657_vm1 = vcmask 523264   ;;  %s1060_s7 = smov 96   ;;  %vm450_vm2 = vcmask 261120  }
  0x81   :  { %728 = vmatpush3.bf16.msra.mxu0 %v804_v2  ;;  %v808_v6 = vld [vmem:[#allocation7 + $0x10] sm:$0xff]   ;;  %v809_v7 = vld [vmem:[#allocation7 + $0x58] sm:$0xff]   ;;  %v811_v9 = vld [vmem:[#allocation7 + $0x60] sm:$0xff]   ;;  %777 = vmatprep.mubr.msk.bf16.mxu1 %vm1059_vm0, %v1058_v0 }
  0x82   :  { %729 = vmatprep.subr.bf16.mxu0 %v805_v3  ;;  %v810_v8 = vld [vmem:[#allocation7 + $0x18] sm:$0xff]   ;;  %v812_v10 = vld [vmem:[#allocation7 + $0x20] sm:$0xff]   ;;  %v813_v11 = vld [vmem:[#allocation7 + $0x68] sm:$0xff]  }
  0x83   :  { %v125_v12 = vld [vmem:[#allocation2 + $0x8] sm:$0xff]  ;;  %v819_v14 = vld [vmem:[%s1319_s4] sm:$0xff]   ;;  %v817_v19 = vld [vmem:[#allocation7 + $0x78] sm:$0xff]  }
  0x84   :  { %v127_v13 = vpack.c.bf16 %v125_v12, %v125_v12  ;;  %v814_v15 = vld [vmem:[#allocation7 + $0x28] sm:$0xff]   ;;  %v815_v16 = vld [vmem:[#allocation7 + $0x70] sm:$0xff]   ;;  %762 = vmatpush3.bf16.msra.mxu1 %v819_v14  ;;  %v821_v20 = vld [vmem:[%s1319_s4 + $0x10] sm:$0xff]  }
  0x85   :  { %730 = vmatpush3.bf16.msra.mxu0 %v806_v4  ;;  %v820_v17 = vld [vmem:[%s1319_s4 + $0x8] sm:$0xff]   ;;  %763 = vmatprep.subr.bf16.mxu1 %v1058_v0  ;;  %v818_v21 = vld [vmem:[#allocation7 + $0x38] sm:$0xff]   ;;  %v124_v22 = vld [vmem:[#allocation2] sm:$0xff] }
  0x86   :  { %731 = vmatprep.subr.bf16.mxu0 %v807_v5  ;;  %295 = vmatprep.mubr.bf16.mxu0 %v127_v13  ;;  %v816_v18 = vld [vmem:[#allocation7 + $0x30] sm:$0xff]   ;;  %v822_v23 = vld [vmem:[%s1319_s4 + $0x18] sm:$0xff]   ;;  %v126_v24 = vpack.c.bf16 %v124_v22, %v124_v22  ;;  %v823_v25 = vld [vmem:[%s1319_s4 + $0x20] sm:$0xff]  }
  0x87   :  { %v824_v26 = vld [vmem:[%s1319_s4 + $0x28] sm:$0xff]   ;;  %v825_v27 = vld [vmem:[%s1319_s4 + $0x30] sm:$0xff]   ;;  %v826_v28 = vld [vmem:[%s1319_s4 + $0x38] sm:$0xff]  }
  0x88   :  { %764 = vmatpush3.bf16.msra.mxu1 %v820_v17  ;;  %v681_v30 = vld [vmem:[#allocation8] ss:$0 sm:$0xff]  ;;  %v827_v38 = vld [vmem:[#allocation11] sm:$0xff]   ;;  %v698_v39 = vld [vmem:[#allocation10] ss:$0 sm:$0xff] }
  0x89   :  { %732 = vmatpush3.bf16.msra.mxu0 %v808_v6  ;;  %765 = vmatprep.subr.bf16.mxu1 %v1058_v0  ;;  %v828_v47 = vld [vmem:[#allocation11 + $0x8] sm:$0xff]   ;;  %v834_v50 = vld [vmem:[%s1323_s8 + $0x14] ss:$8 sps:$4 sm:$0xff]   ;;  %v832_v51 = vld [vmem:[%s1323_s8 + $0x10] ss:$8 sps:$4 sm:$0xff]   ;;  %v1061_v6 = vmov 0  }
  0x8a   :  { %733 = vmatprep.subr.bf16.mxu0 %v809_v7  ;;  %v829_v48 = vld [vmem:[%s1323_s8] ss:$8 sps:$4 sm:$0xff]   ;;  %v831_v49 = vld [vmem:[%s1323_s8 + $0x4] ss:$8 sps:$4 sm:$0xff]   ;;  %v840_v55 = vld [vmem:[%s1323_s8 + $0x34] ss:$8 sps:$4 sm:$0xff]  }
  0x8b   :  { %v837_v52 = vld [vmem:[%s1323_s8 + $0x24] ss:$8 sps:$4 sm:$0xff]   ;;  %v835_v54 = vld [vmem:[%s1323_s8 + $0x20] ss:$8 sps:$4 sm:$0xff]   ;;  %v838_v56 = vld [vmem:[%s1323_s8 + $0x30] ss:$8 sps:$4 sm:$0xff]  }
  0x8c   :  { %766 = vmatpush3.bf16.msra.mxu1 %v821_v20  ;;  %v843_v57 = vld [vmem:[%s1323_s8 + $0x44] ss:$8 sps:$4 sm:$0xff]   ;;  %v841_v58 = vld [vmem:[%s1323_s8 + $0x40] ss:$8 sps:$4 sm:$0xff]   ;;  %v846_v59 = vld [vmem:[%s1323_s8 + $0x54] ss:$8 sps:$4 sm:$0xff]  }
  0x8d   :  { %734 = vmatpush3.bf16.msra.mxu0 %v810_v8  ;;  %767 = vmatprep.subr.bf16.mxu1 %v1058_v0  ;;  %v844_v60 = vld [vmem:[%s1323_s8 + $0x50] ss:$8 sps:$4 sm:$0xff]   ;;  %v849_v61 = vld [vmem:[%s1323_s8 + $0x64] ss:$8 sps:$4 sm:$0xff]   ;;  %v847_v62 = vld [vmem:[%s1323_s8 + $0x60] ss:$8 sps:$4 sm:$0xff]  }
  0x8e   :  { %735 = vmatprep.subr.bf16.mxu0 %v811_v9  ;;  %v419_v63 = vld [vmem:[#allocation5] sm:$0xff]  ;;  %v707_v7 = vld [vmem:[#allocation13] ss:$0 sm:$0xff] }
  0x8f   :  { %v852_v4 = vld [vmem:[%s1323_s8 + $0x74] ss:$8 sps:$4 sm:$0xff]   ;;  %v850_v5 = vld [vmem:[%s1323_s8 + $0x70] ss:$8 sps:$4 sm:$0xff]   ;;  %s1062_s8 = smov [#allocation14]  }
  0x90   :  { %768 = vmatpush3.bf16.msra.mxu1 %v822_v23 }
  0x91   :  { %736 = vmatpush3.bf16.msra.mxu0 %v812_v10  ;;  %769 = vmatprep.subr.bf16.mxu1 %v1058_v0 }
  0x92   :  { %737 = vmatprep.subr.bf16.mxu0 %v813_v11 }
  0x94   :  { %770 = vmatpush3.bf16.msra.mxu1 %v823_v25 }
  0x95   :  { %738 = vmatpush3.bf16.msra.mxu0 %v814_v15  ;;  %771 = vmatprep.subr.bf16.mxu1 %v1058_v0  ;;  %v514_v15 = vlaneseq }
  0x96   :  { %739 = vmatprep.subr.bf16.mxu0 %v815_v16 }
  0x97   :  { %v515_v16 = vshrl.u32 %v514_v15, 7 }
  0x98   :  { %772 = vmatpush3.bf16.msra.mxu1 %v824_v26 }
  0x99   :  { %740 = vmatpush3.bf16.msra.mxu0 %v816_v18  ;;  %773 = vmatprep.subr.bf16.mxu1 %v1058_v0  ;;  %v516_v17 = vsub.s32 0, %v515_v16  ;;  %v512_v18 = vld [vmem:[%s1324_s9] sm:$0x3]  ;;  %s665_s9 = sshll.u32 %s1062_s8, 4  ;;  %s666_s9 = int_to_ptr.vmem [resolvable:$true] %s665_s9 }
  0x9a   :  { %741 = vmatprep.subr.bf16.mxu0 %v817_v19  ;;  %v520_v19 = vsub.s32 1, %v515_v16  ;;  %s1017_s5 = scalar_lea.vmem %s666_s9, 256  ;;  %p1022_p1 = scmp.lt.s32.totalorder %s666_s9, %s666_s9 }
  0x9b   :  { %v517_v20 = vrot.slane %v512_v18, %v516_v17  ;;  %p1018_p0 = scmp.ne.s32.totalorder %s666_s9, %s1017_s5  ;;  %p1023_p2 = scmp.lt.s32.totalorder %s1017_s5, %s1017_s5 }
  0x9c   :  { %774 = vmatpush3.bf16.msra.mxu1 %v825_v27 }
  0x9d   :  { %742 = vmatpush3.bf16.msra.mxu0 %v818_v21  ;;  %775 = vmatprep.subr.bf16.mxu1 %v1058_v0  ;;  %v521_v21 = vrot.slane %v512_v18, %v520_v19  ;;  %p1024_p3 = por %p1023_p2, %p1022_p1 }
  0x9e   :  { %781 = vmatprep.subr.bf16.mxu0 %v1058_v0 }
  0x9f   :  { %p1025_p4 = pnand %p1024_p3, %p1018_p0 }
  0xa0   :  { %296 = vmatmul.mubr.bf16.vlgmr.msra.gmra.mrb[0].mxu0 %v126_v24  ;;  %776 = vmatpush3.bf16.msra.mxu1 %v826_v28 }
  0xa1   :  { %785 = vmatprep.mubr.msk.bf16.mxu0 %vm1059_vm0, %v1058_v0  ;;  %782 = vmatpush3.bf16.msra.mxu0 %v827_v38 }
  0xa2   :  { %783 = vmatprep.subr.bf16.mxu0 %v1058_v0  ;;  %604 = vmatprep.subr.bf16.mxu1 %v831_v49 }
  0xa5   :  { %784 = vmatpush3.bf16.msra.mxu0 %v828_v47 }
 0x173   :  { %v743_v29 = vpop.f32.mrb[0].mxu0 }
 0x174   :  { %v744_v31 = vpop.f32.mrb[1].mxu0 }
 0x175   :  { %v745_v32 = vadd.f32 %v744_v31, %v743_v29  ;;  %v746_v33 = vpop.f32.mrb[2].mxu0 }
 0x176   :  { %v747_v34 = vpop.f32.mrb[3].mxu0 }
 0x177   :  { %v298_v35 = vadd.f32 %v745_v32, %v681_v30 }
 0x179   :  { %v303_v36 = vmax.f32 %v298_v35, 0.0 }
 0x17b   :  { %v304_v37 = vpack.c.bf16 %v303_v36, %v303_v36 }
 0x17d   :  { %778 = vmatmul.mubr.bf16.vlgmr.msra.gmra.mrb[0].mxu1 %v304_v37 }
 0x17e   :  { %605 = vmatpush1.bf16.msra.mxu1 %v829_v48  ;;  %636 = vmatprep.mubr.bf16.mxu1 %v1061_v6 }
 0x17f   :  { %606 = vmatprep.subr.bf16.mxu1 %v834_v50 }
 0x182   :  { %607 = vmatpush1.bf16.msra.mxu1 %v832_v51 }
 0x183   :  { %608 = vmatprep.subr.bf16.mxu1 %v837_v52 }
 0x186   :  { %609 = vmatpush1.bf16.msra.mxu1 %v835_v54 }
 0x187   :  { %610 = vmatprep.subr.bf16.mxu1 %v840_v55 }
 0x18a   :  { %611 = vmatpush1.bf16.msra.mxu1 %v838_v56 }
 0x18b   :  { %612 = vmatprep.subr.bf16.mxu1 %v843_v57 }
 0x18e   :  { %613 = vmatpush1.bf16.msra.mxu1 %v841_v58 }
 0x18f   :  { %614 = vmatprep.subr.bf16.mxu1 %v846_v59 }
 0x192   :  { %615 = vmatpush1.bf16.msra.mxu1 %v844_v60 }
 0x193   :  { %616 = vmatprep.subr.bf16.mxu1 %v849_v61 }
 0x196   :  { %617 = vmatpush1.bf16.msra.mxu1 %v847_v62 }
 0x197   :  { %618 = vmatprep.subr.bf16.mxu1 %v852_v4 }
 0x19a   :  { %619 = vmatpush1.bf16.msra.mxu1 %v850_v5 }
 0x250   :  { %v410_v40 = vpop.f32.mrb[0].mxu1 }
 0x251   :  { %v411_v41 = vadd.f32 %v698_v39, %v410_v40  ;;  %v779_v42 = vpop.f32.mrb[1].mxu1 }
 0x252   :  { %v413_v43 = vpop.f32.mrb[2].mxu1 }
 0x253   :  { %v416_v44 = vmul.f32 0.5, %v411_v41  ;;  %658 = vst.msk [vmem:[%s1326_s11] sm:$0xff] %vm657_vm1, %v411_v41  ;;  %v780_v45 = vpop.f32.mrb[3].mxu1 }
 0x255   :  { %v417_v46 = vmul.f32 1.442695, %v416_v44 }
 0x257   :  { %853 = vpow2.f32 %v417_v46 }
 0x261   :  { %v854_v53 = vpop.eup %853 }
 0x262   :  { %421 = vrot.lane.b32.xlu0 %v854_v53, %s1060_s7 }
 0x2d4   :  { %v422_v0 = vpop.permute.xlu0 %421 }
 0x2d5   :  { %v424_v1 = vmul.f32 %v422_v0, %v419_v63 }
 0x2d7   :  { %v425_v2 = vadd.f32 %v424_v1, %v411_v41 }
 0x2d9   :  { %v426_v3 = vpack.c.bf16 %v425_v2, %v425_v2 }
 0x2db   :  { %786 = vmatmul.mubr.msk.bf16.vlgmr.msra.gmra.mrb[4].mxu0 %vm450_vm2, %v426_v3 }
 0x3ae   :  { %v488_v8 = vpop.f32.mrb[4].mxu0 }
 0x3af   :  { %v489_v9 = vadd.f32 %v707_v7, %v488_v8  ;;  %v787_v10 = vpop.f32.mrb[5].mxu0 }
 0x3b0   :  { %v491_v11 = vpop.f32.mrb[6].mxu0 }
 0x3b1   :  { %v494_v12 = vmax.f32 %v489_v9, 0.0  ;;  %v788_v13 = vpop.f32.mrb[7].mxu0 }
 0x3b3   :  { %v495_v14 = vpack.c.bf16 %v494_v12, %v494_v12 }
 0x3b5   :  { %637 = vmatmul.mubr.bf16.vlgmr.msra.gmra.mrb[4].mxu1 %v495_v14 }
 0x488   :  { %v638_v22 = vpop.f32.mrb[4].mxu1 }
 0x489   :  { %v639_v23 = vadd.f32 %v638_v22, %v517_v20  ;;  %v640_v24 = vpop.f32.mrb[5].mxu1 }
 0x48a   :  { %v641_v25 = vadd.f32 %v640_v24, %v521_v21  ;;  %v642_v26 = vpop.f32.mrb[6].mxu1 }
 0x48b   :  { %v645_v27 = vsub.f32 0.0, %v639_v23  ;;  %v643_v28 = vpop.f32.mrb[7].mxu1 }
 0x48c   :  { %v646_v29 = vsub.f32 0.0, %v641_v25 }
 0x48d   :  { %v647_v30 = vmul.f32 1.442695, %v645_v27 }
 0x48e   :  { %v649_v31 = vmul.f32 1.442695, %v646_v29 }
 0x48f   :  { %855 = vpow2.f32 %v647_v30 }
 0x490   :  { %857 = vpow2.f32 %v649_v31 }
 0x499   :  { %v856_v32 = vpop.eup %855 }
 0x49a   :  { %v858_v33 = vpop.eup %857  ;;  %v651_v34 = vadd.f32 1.0, %v856_v32 }
 0x49b   :  { %v652_v35 = vadd.f32 1.0, %v858_v33 }
 0x49c   :  { %859 = vrcp.f32 %v651_v34 }
 0x49d   :  { %861 = vrcp.f32 %v652_v35 }
 0x4a6   :  { %v860_v36 = vpop.eup %859 }
 0x4a7   :  { %v862_v37 = vpop.eup %861  ;;  %655 = vst [vmem:[#allocation14] sm:$0xff] %v860_v36 }
 0x4a8   :  { %656 = vst [vmem:[#allocation14 + $0x8] sm:$0xff] %v862_v37 }
 0x4a9   :  { %1028 = shalt.err (!%p1025_p4)
}
 0x4aa   :  { %s1029_s7 = scalar_lea.hbm %s1325_s10, 256 }
 0x4ab   :  { %p1030_p5 = scmp.ne.s32.totalorder %s1325_s10, %s1029_s7  ;;  %p1033_p6 = scmp.lt.u32.totalorder %s1029_s7, %s1325_s10 }
 0x4ad   :  { %p1035_p7 = pnand %p1033_p6, %p1030_p5 }
 0x4af   :  { %1038 = shalt.err (!%p1035_p7)
}
 0x4b0   :  { %668 = dma.vmem_to_hbm [thread:$0]  %s666_s9, 256, %s1325_s10, [#allocation4]  }
 0x4b1   :  { %1047 = dma.done.wait [#allocation4], 256  }
 0x4b2   :  { %1048 = vsyncadd [#allocation4], 4294967040 }
 0x4b3   :  { %676 = vsyncpa [#allocation3], 1 }
 0x4b4   :  { %677 = vsyncpa [#allocation6], 1 }
 0x4b5   :  { %678 = vsyncpa [#allocation9], 1 }
 0x4b6   :  { %679 = vsyncpa [#allocation12], 1 }
 0x4b7   :  { %680 = vsyncpa [#allocation4], 1 }

</bundles_post_ra>
